<compile_context>
chip_gen: v5e
topology: v5e:2x2
jax: 0.10.0
libtpu: 0.0.40
codegen_flags: <defaults>
</compile_context>

<pallas_src>
import functools

import jax
import jax.numpy as jnp
from jax.experimental import pallas as pl
from jax.experimental.pallas import tpu as pltpu

_VMEM_BUDGET = 44 << 20      # conservative double-buffered working-set budget (v7x-safe)
_VMEM_LIMIT_CAP = 56 << 20   # never ask the compiler for more than this


# --------------------------------------------------------------------------
# Small static helpers (all run at trace time on static shapes).
# --------------------------------------------------------------------------
def _round_up(x: int, m: int) -> int:
    return ((x + m - 1) // m) * m


def _sublane(dtype) -> int:
    # 4-byte -> 8 rows, 2-byte -> 16 rows, 1-byte -> 32 rows per vreg sublane pack.
    return {4: 8, 2: 16, 1: 32}.get(jnp.dtype(dtype).itemsize, 8)


def _divisor_tiles(padded: int, align: int):
    """All multiples of `align` that evenly divide `padded` (padded % align == 0)."""
    q = padded // align
    return sorted(align * d for d in range(1, q + 1) if q % d == 0)


def _pick_m_tile(m: int, desired: int, align: int) -> int:
    desired = max(desired, 128)
    m_al = _round_up(m, align)
    if m_al <= desired:
        return m_al                       # single block, zero extra padding
    cands = list(range(128, desired + 1, 128))
    padded = {t: _round_up(m_al, t) for t in cands}
    best_pad = min(padded.values())
    # near-ties (<= ~5% extra padding) resolve toward the larger tile
    ok = [t for t in cands if padded[t] <= int(best_pad * 1.05) + align]
    return max(ok)


def _pick_n_tile(np128: int, desired: int, want_two_blocks: bool) -> int:
    desired = max(desired, 128)
    tiles = [t for t in _divisor_tiles(np128, 128) if t <= desired]
    if want_two_blocks:
        halves = [t for t in tiles if np128 // t >= 2]
        if halves:
            return max(halves)
    return max(tiles) if tiles else 128


def _footprint(tm, tn, tk, xb, wb, ob, split) -> int:
    f = 2 * tm * tk * xb + 2 * tk * tn * wb + 2 * tn * 4 + 2 * tm * tn * ob
    if split:
        f += tm * tn * 4                  # f32 accumulator scratch
    return f


def _pick_k_tile(kp, tm, tn, xb, wb, ob, requested) -> int:
    tiles = _divisor_tiles(kp, 128)
    if requested is not None:
        ok = [t for t in tiles if t <= max(requested, 128)]
        return max(ok) if ok else 128
    if _footprint(tm, tn, kp, xb, wb, ob, split=False) <= _VMEM_BUDGET:
        return kp                         # full-K collapse: one MXU pass per output tile
    ok = [t for t in tiles if _footprint(tm, tn, t, xb, wb, ob, split=True) <= _VMEM_BUDGET]
    return max(ok) if ok else 128


# --------------------------------------------------------------------------
# Kernels
# --------------------------------------------------------------------------
def _linear_relu_kernel(x_ref, w_ref, b_ref, o_ref):
    """Full-K path: x (tm, K) @ w (K, tn) + b, ReLU, cast — single MXU pass, no scratch."""
    acc = jnp.dot(x_ref[...], w_ref[...], preferred_element_type=jnp.float32)
    o_ref[...] = jnp.maximum(acc + b_ref[...], 0.0).astype(o_ref.dtype)


def _linear_relu_kernel_ksplit(x_ref, w_ref, b_ref, o_ref, acc_ref):
    """Split-K fallback: f32 VMEM accumulator, fused bias+ReLU+cast epilogue."""
    kk = pl.program_id(2)

    @pl.when(kk == 0)
    def _init():
        acc_ref[...] = jnp.zeros_like(acc_ref)

    acc_ref[...] += jnp.dot(x_ref[...], w_ref[...], preferred_element_type=jnp.float32)

    @pl.when(kk == pl.num_programs(2) - 1)
    def _finalize():
        o_ref[...] = jnp.maximum(acc_ref[...] + b_ref[...], 0.0).astype(o_ref.dtype)


# --------------------------------------------------------------------------
# One-time parameter preparation (hoisted out of the per-call path).
# --------------------------------------------------------------------------
def prepare_params(weight, bias, compute_dtype=None):
    """weight: [out, in] (PyTorch) -> (Kp, Np) padded, MXU-friendly layout; bias -> (1, Np) f32."""
    n, k = weight.shape
    assert bias.shape == (n,)
    dtype = compute_dtype if compute_dtype is not None else weight.dtype
    kp, np_ = _round_up(k, 128), _round_up(n, 128)
    w_kn = jnp.pad(jnp.transpose(weight), ((0, kp - k), (0, np_ - n))).astype(dtype)
    b_row = jnp.pad(bias.astype(jnp.float32), (0, np_ - n)).reshape(1, np_)
    return w_kn, b_row


# --------------------------------------------------------------------------
# Forward wrapper
# --------------------------------------------------------------------------
@functools.partial(jax.jit, static_argnames=("out_dim", "out_dtype", "tm", "tn", "tk"))
def base_layer(x, w_prepared, b_prepared, *, out_dim, out_dtype=None, tm=512, tn=512, tk=None):
    """ReLU(x @ W^T + b) using prepared (pre-transposed, pre-padded) parameters.

    x:          [batch, input_dim]
    w_prepared: [Kp, Np]   from prepare_params (W^T, zero-padded to 128 multiples)
    b_prepared: [1,  Np]   float32 bias row
    out_dim:    logical output_dim (Np may be padded)
    """
    m, k_dim = x.shape
    kp, np128 = w_prepared.shape
    assert kp >= k_dim and np128 >= out_dim

    compute_dtype = w_prepared.dtype
    if out_dtype is None:
        out_dtype = x.dtype
    if x.dtype != compute_dtype:
        x = x.astype(compute_dtype)

    xb = wb = jnp.dtype(compute_dtype).itemsize
    ob = jnp.dtype(out_dtype).itemsize

    # --- adaptive tile selection (static, trace-time) ----------------------
    align_m = _sublane(compute_dtype)
    tm_eff = _pick_m_tile(m, tm, align_m)
    mp = _round_up(_round_up(m, align_m), tm_eff)
    grid_m = mp // tm_eff

    tn_eff = _pick_n_tile(np128, tn, want_two_blocks=(grid_m == 1))
    grid_n = np128 // tn_eff

    tk_eff = _pick_k_tile(kp, tm_eff, tn_eff, xb, wb, ob, tk)
    grid_k = kp // tk_eff

    # Only x needs per-call zero padding (neutral for matmul; sliced off after).
    if (mp, kp) != (m, k_dim):
        x = jnp.pad(x, ((0, mp - m), (0, kp - k_dim)))

    vmem_bytes = _footprint(tm_eff, tn_eff, tk_eff, xb, wb, ob, split=(grid_k > 1))
    vmem_limit = min(max(vmem_bytes + (8 << 20), 32 << 20), _VMEM_LIMIT_CAP)

    out_shape = jax.ShapeDtypeStruct((mp, np128), out_dtype)

    if grid_k == 1:
        out_padded = pl.pallas_call(
            _linear_relu_kernel,
            out_shape=out_shape,
            grid_spec=pltpu.PrefetchScalarGridSpec(
                num_scalar_prefetch=0,
                grid=(grid_m, grid_n),
                in_specs=[
                    pl.BlockSpec((tm_eff, tk_eff), lambda i, j: (i, 0)),   # x
                    pl.BlockSpec((tk_eff, tn_eff), lambda i, j: (0, j)),   # W^T (K, N)
                    pl.BlockSpec((1, tn_eff), lambda i, j: (0, j)),        # bias
                ],
                out_specs=pl.BlockSpec((tm_eff, tn_eff), lambda i, j: (i, j)),
            ),
            compiler_params=pltpu.CompilerParams(
                dimension_semantics=("parallel", "parallel"),
                vmem_limit_bytes=vmem_limit,
            ),
        )(x, w_prepared, b_prepared)
    else:
        # TODO(synk): for f32 outputs we could accumulate directly into o_ref and
        # drop the scratch; kept generic (any out dtype) for simplicity.
        out_padded = pl.pallas_call(
            _linear_relu_kernel_ksplit,
            out_shape=out_shape,
            grid_spec=pltpu.PrefetchScalarGridSpec(
                num_scalar_prefetch=0,
                grid=(grid_m, grid_n, grid_k),
                in_specs=[
                    pl.BlockSpec((tm_eff, tk_eff), lambda i, j, kk: (i, kk)),
                    pl.BlockSpec((tk_eff, tn_eff), lambda i, j, kk: (kk, j)),
                    pl.BlockSpec((1, tn_eff), lambda i, j, kk: (0, j)),
                ],
                out_specs=pl.BlockSpec((tm_eff, tn_eff), lambda i, j, kk: (i, j)),
                scratch_shapes=[pltpu.VMEM((tm_eff, tn_eff), jnp.float32)],
            ),
            compiler_params=pltpu.CompilerParams(
                dimension_semantics=("parallel", "parallel", "arbitrary"),
                vmem_limit_bytes=vmem_limit,
            ),
        )(x, w_prepared, b_prepared)

    return out_padded[:m, :out_dim]


def _reference(x, weight, bias):
    return jnp.maximum(x @ weight.T + bias, 0.0)


if __name__ == "__main__":
    key = jax.random.PRNGKey(0)

    # --- 1) Small demo shape matching the module's toy usage (f32 path) ----
    k_x, k_w, k_b = jax.random.split(key, 3)
    batch, input_dim, output_dim = 8, 32, 16
    x = jax.random.normal(k_x, (batch, input_dim), dtype=jnp.float32)
    weight = jax.random.normal(k_w, (output_dim, input_dim), dtype=jnp.float32) * 0.1
    bias = jax.random.normal(k_b, (output_dim,), dtype=jnp.float32) * 0.1

    w_p, b_p = prepare_params(weight, bias)
    out = base_layer(x, w_p, b_p, out_dim=output_dim)
    jax.block_until_ready(out)
    assert out.shape == (batch, output_dim)
    assert jnp.allclose(out, _reference(x, weight, bias), atol=1e-5, rtol=1e-5)

    # --- 2) Ragged shape: adaptive tiles, per-call x padding, >1 N block ---
    k_x2, k_w2, k_b2 = jax.random.split(jax.random.PRNGKey(1), 3)
    m2, k2, n2 = 160, 384, 272
    x2 = jax.random.normal(k_x2, (m2, k2), dtype=jnp.float32)
    w2 = jax.random.normal(k_w2, (n2, k2), dtype=jnp.float32) * 0.05
    b2 = jax.random.normal(k_b2, (n2,), dtype=jnp.float32) * 0.05
    w2_p, b2_p = prepare_params(w2, b2)
    ref2 = _reference(x2, w2, b2)

    out2 = base_layer(x2, w2_p, b2_p, out_dim=n2)
    jax.block_until_ready(out2)
    assert out2.shape == (m2, n2)
    assert jnp.allclose(out2, ref2, atol=1e-4, rtol=1e-4)

    # --- 3) Force split-K to exercise the accumulator fallback path --------
    out3 = base_layer(x2, w2_p, b2_p, out_dim=n2, tk=128)
    jax.block_until_ready(out3)
    assert jnp.allclose(out3, ref2, atol=1e-4, rtol=1e-4)

    # --- 4) Optional bf16-operand / f32-accumulation path (MXU-native) -----
    w2_bf, b2_bf = prepare_params(w2, b2, compute_dtype=jnp.bfloat16)
    out4 = base_layer(x2, w2_bf, b2_bf, out_dim=n2)
    jax.block_until_ready(out4)
    ref_bf = jnp.maximum(
        jnp.dot(x2.astype(jnp.bfloat16), w2.T.astype(jnp.bfloat16),
                preferred_element_type=jnp.float32) + b2, 0.0)
    assert out4.shape == (m2, n2)
    assert jnp.allclose(out4, ref_bf, atol=2e-2, rtol=2e-2)

    print("KERNEL_OK")
</pallas_src>

<mosaic_0001>
module attributes {stable_mosaic.version = 11 : i64} {
  func.func @_linear_relu_kernel(%arg0: i32, %arg1: i32, %arg2: memref<8x128xf32, #tpu.memory_space<vmem>>, %arg3: memref<128x128xf32, #tpu.memory_space<vmem>>, %arg4: memref<1x128xf32, #tpu.memory_space<vmem>>, %arg5: memref<8x128xf32, #tpu.memory_space<vmem>>) attributes {dimension_semantics = [#tpu.dimension_semantics<parallel>, #tpu.dimension_semantics<parallel>], iteration_bounds = array<i64: 1, 1>, scalar_prefetch = 0 : i64, scratch_operands = 0 : i64, tpu.core_type = #tpu.core_type<tc>, window_params = [{transform_indices = @transform_0, window_bounds = array<i64: 8, 128>}, {transform_indices = @transform_1, window_bounds = array<i64: 128, 128>}, {transform_indices = @transform_2, window_bounds = array<i64: 1, 128>}, {transform_indices = @transform_3, window_bounds = array<i64: 8, 128>}]} {
    %c0 = arith.constant 0 : index
    %c0_0 = arith.constant 0 : index
    %0 = vector.load %arg2[%c0, %c0_0] : memref<8x128xf32, #tpu.memory_space<vmem>>, vector<8x128xf32>
    %c0_1 = arith.constant 0 : index
    %c0_2 = arith.constant 0 : index
    %1 = vector.load %arg3[%c0_1, %c0_2] : memref<128x128xf32, #tpu.memory_space<vmem>>, vector<128x128xf32>
    %cst = arith.constant dense<0.000000e+00> : vector<8x128xf32>
    %2 = tpu.matmul %0, %1, %cst {dimension_numbers = #tpu.dot_dimension_numbers<[1], [0], [0], [1], [0, 0, 1, 1], [], []>} : vector<8x128xf32>, vector<128x128xf32>, vector<8x128xf32> -> vector<8x128xf32>
    %c0_3 = arith.constant 0 : index
    %c0_4 = arith.constant 0 : index
    %3 = vector.load %arg4[%c0_3, %c0_4] : memref<1x128xf32, #tpu.memory_space<vmem>>, vector<1x128xf32>
    %4 = vector.broadcast %3 : vector<1x128xf32> to vector<8x128xf32>
    %5 = arith.addf %2, %4 : vector<8x128xf32>
    %cst_5 = arith.constant 0.000000e+00 : f32
    %6 = vector.broadcast %cst_5 : f32 to vector<8x128xf32>
    %7 = arith.maximumf %5, %6 : vector<8x128xf32>
    %c0_6 = arith.constant 0 : index
    %c0_7 = arith.constant 0 : index
    %8 = vector.load %arg5[%c0_6, %c0_7] : memref<8x128xf32, #tpu.memory_space<vmem>>, vector<8x128xf32>
    tpu.vector_store %arg5[%c0_6, %c0_7], %7 {strides = array<i32>} : memref<8x128xf32, #tpu.memory_space<vmem>>, vector<8x128xf32>,
    return
  }
  func.func @transform_0(%arg0: i32, %arg1: i32) -> (i32, i32) {
    %c0_i32 = arith.constant 0 : i32
    %c0_i32_0 = arith.constant 0 : i32
    return %arg0, %c0_i32 : i32, i32
  }
  func.func @transform_1(%arg0: i32, %arg1: i32) -> (i32, i32) {
    %c0_i32 = arith.constant 0 : i32
    %c0_i32_0 = arith.constant 0 : i32
    return %c0_i32, %arg1 : i32, i32
  }
  func.func @transform_2(%arg0: i32, %arg1: i32) -> (i32, i32) {
    %c0_i32 = arith.constant 0 : i32
    %c0_i32_0 = arith.constant 0 : i32
    return %c0_i32, %arg1 : i32, i32
  }
  func.func @transform_3(%arg0: i32, %arg1: i32) -> (i32, i32) {
    %c0_i32 = arith.constant 0 : i32
    return %arg0, %arg1 : i32, i32
  }
}

</mosaic_0001>

<bundles_post_ra>
// kernel: base_layer.1
= control target key start
LH: loop header
LB: loop body
LE: loop exit
PB: predicated region body
PF: predicated region fallthrough
CT: control target
= control target key end

     0   :  { %8 = vsyncpa [#allocation3], 0  ;;  %s184_s0 = inlined_call_operand.vmem [shape: f32[8,128], index: 0, kind: input, shape index: {}]   ;;  %s185_s1 = inlined_call_operand.hbm [shape: f32[128,128], index: 1, kind: input, shape index: {}]   ;;  %s186_s2 = inlined_call_operand.vmem [shape: f32[1,128], index: 2, kind: input, shape index: {}]   ;;  %s187_s3 = inlined_call_operand.hbm [shape: f32[8,128], index: 3, kind: output, shape index: {}]  }
   0x1   :  { %9 = vsyncpa [#allocation4], 0  ;;  %s16_s14 = sshll.u32 %s185_s1, 4  ;;  %s148_s15 = smov [#allocation2]   ;;  %s17_s14 = int_to_ptr.hbm [resolvable:$true] %s16_s14 }
   0x2   :  { %s18_s16 = sshll.u32 %s148_s15, 4  ;;  %s149_s17 = smov 128   ;;  %s19_s16 = int_to_ptr.vmem [resolvable:$true] %s18_s16 }
   0x3   :  { %s150_s18 = smov 8  }
   0x4   :  { %24 = dma.hbm_to_vmem [thread:$0]  %s17_s14, 2048, %s19_s16, [#allocation3], %s149_s17, %s149_s17, %s150_s18  }
   0x5   :  { %144 = dma.done.wait [#allocation3], 2048  }
   0x6   :  { %145 = vsyncadd [#allocation3], 4294965248  ;;  %v47_v0 = vld [vmem:[#allocation2 + $0x78] sm:$0xff]  ;;  %v46_v1 = vld [vmem:[#allocation2 + $0x70] sm:$0xff]  ;;  %s151_s22 = smov [#allocation5]   ;;  %s81_s26 = sshll.u32 %s187_s3, 4  ;;  %s82_s26 = int_to_ptr.hbm [resolvable:$true] %s81_s26 }
   0x7   :  { %52 = vmatpush.msra.mxu0 %v47_v0  ;;  %v45_v2 = vld [vmem:[#allocation2 + $0x68] sm:$0xff]  ;;  %v44_v3 = vld [vmem:[#allocation2 + $0x60] sm:$0xff]  ;;  %v43_v4 = vld [vmem:[#allocation2 + $0x58] sm:$0xff]  ;;  %s79_s23 = sshll.u32 %s151_s22, 4  ;;  %s80_s23 = int_to_ptr.vmem [resolvable:$true] %s79_s23 }
   0x8   :  { %v42_v5 = vld [vmem:[#allocation2 + $0x50] sm:$0xff]  ;;  %v41_v6 = vld [vmem:[#allocation2 + $0x48] sm:$0xff]  ;;  %v40_v7 = vld [vmem:[#allocation2 + $0x40] sm:$0xff] }
   0x9   :  { %53 = vmatpush.msra.mxu0 %v46_v1  ;;  %v39_v8 = vld [vmem:[#allocation2 + $0x38] sm:$0xff]  ;;  %v38_v9 = vld [vmem:[#allocation2 + $0x30] sm:$0xff]  ;;  %v37_v10 = vld [vmem:[#allocation2 + $0x28] sm:$0xff] }
   0xa   :  { %v36_v11 = vld [vmem:[#allocation2 + $0x20] sm:$0xff]  ;;  %v35_v12 = vld [vmem:[#allocation2 + $0x18] sm:$0xff]  ;;  %v34_v13 = vld [vmem:[#allocation2 + $0x10] sm:$0xff] }
   0xb   :  { %54 = vmatpush.msra.mxu0 %v45_v2  ;;  %v33_v14 = vld [vmem:[#allocation2 + $0x8] sm:$0xff]  ;;  %v32_v15 = vld [vmem:[#allocation2] sm:$0xff] }
   0xc   :  { %v31_v16 = vld [vmem:[%s184_s0] sm:$0xff] }
   0xd   :  { %55 = vmatpush.msra.mxu0 %v44_v3  ;;  %v95_v17 = vld [vmem:[%s186_s2] ss:$0 sm:$0xff] }
   0xf   :  { %56 = vmatpush.msra.mxu0 %v43_v4 }
  0x11   :  { %57 = vmatpush.msra.mxu0 %v42_v5 }
  0x13   :  { %58 = vmatpush.msra.mxu0 %v41_v6 }
  0x15   :  { %59 = vmatpush.msra.mxu0 %v40_v7 }
  0x17   :  { %60 = vmatpush.msra.mxu0 %v39_v8 }
  0x19   :  { %61 = vmatpush.msra.mxu0 %v38_v9 }
  0x1b   :  { %62 = vmatpush.msra.mxu0 %v37_v10 }
  0x1d   :  { %63 = vmatpush.msra.mxu0 %v36_v11 }
  0x1f   :  { %64 = vmatpush.msra.mxu0 %v35_v12 }
  0x21   :  { %65 = vmatpush.msra.mxu0 %v34_v13 }
  0x23   :  { %66 = vmatpush.msra.mxu0 %v33_v14 }
  0x25   :  { %67 = vmatpush.msra.mxu0 %v32_v15 }
  0x26   :  { %68 = vmatmul.f32.vlgmr.msra.gmra.mxu0 %v31_v16 }
  0xa3   :  { %v69_v18 = vpop.f32.mrf.mxu0 }
  0xa4   :  { %v70_v19 = vadd.f32 %v95_v17, %v69_v18 }
  0xa6   :  { %v72_v20 = vmax.f32 %v70_v19, 0.0 }
  0xa8   :  { %73 = vst [vmem:[#allocation5] sm:$0xff] %v72_v20 }
  0xa9   :  { %84 = dma.vmem_to_hbm [thread:$0]  %s80_s23, 128, %s82_s26, [#allocation4]  }
  0xaa   :  { %146 = dma.done.wait [#allocation4], 128  }
  0xab   :  { %147 = vsyncadd [#allocation4], 4294967168 }
  0xac   :  { %89 = vsyncpa [#allocation3], 1 }
  0xad   :  { %90 = vsyncpa [#allocation4], 1 }

</bundles_post_ra>
